<compile_context>
chip_gen: v7x
topology: tpu7x:2x2x1
jax: 0.10.0
libtpu: 0.0.40
codegen_flags: <defaults>
</compile_context>

<pallas_src>
import jax
import jax.numpy as jnp
from jax import lax
from jax.experimental import pallas as pl
from jax.experimental.pallas import tpu as pltpu

K = 3        # kernel size
STRIDE = 2
PAD = 1


def _round_up(x, m):
    return ((x + m - 1) // m) * m


def _choose_tile_s(s, kkc, c_out, in_bytes, out_bytes, budget_bytes):
    """Largest lane-aligned spatial tile whose working set fits the VMEM budget."""
    s_ceil = _round_up(s, 128)
    best = 128
    for cand in (128, 256, 512, 1024, 2048):
        if cand > s_ceil:
            break
        need = (2 * kkc * cand * in_bytes        # double-buffered im2col tile
                + 2 * c_out * cand * out_bytes   # double-buffered output tile
                + 2 * kkc * c_out * in_bytes     # weight (worst case: 2 buffers)
                + c_out * cand * 4)              # f32 matmul result before cast
        if need <= budget_bytes:
            best = cand
    return best


def _downsample_kernel(xcol_ref, w_ref, b_ref, o_ref):
    """One MXU contraction per (batch, spatial-tile) grid step.

    xcol_ref: (1, K*K*C_in, TS)  im2col tap planes, flat output spatial on lanes
    w_ref   : (C_out, K*K*C_in)  folded conv weight (grid-invariant)
    b_ref   : (C_out, 1)         f32 bias (grid-invariant)
    o_ref   : (1, C_out, TS)     lane-dense output tile
    """
    acc = jnp.dot(w_ref[...], xcol_ref[0],
                  preferred_element_type=jnp.float32)      # (C_out, TS) f32
    acc = acc + b_ref[...]                                 # single VPU pass (bias)
    o_ref[0, :, :] = acc.astype(o_ref.dtype)


def downsample_forward(x, weight, bias, *, compute_dtype=None,
                       vmem_budget_bytes=12 * 1024 * 1024):
    """Conv2d(dim, dim, 3, stride=2, padding=1) forward.

    x      : (N, C, H, W)        NCHW (PyTorch layout)
    weight : (C_out, C_in, 3, 3) OIHW (PyTorch Conv2d layout)
    bias   : (C_out,)
    compute_dtype: optional MXU operand dtype (e.g. jnp.bfloat16 on v6e/v7x);
                   accumulation, bias and output stay float32.
    returns: (N, C_out, ceil(H/2), ceil(W/2))
    """
    N, C_in, H, W = x.shape
    C_out = weight.shape[0]
    assert weight.shape == (C_out, C_in, K, K)
    OH = (H + 2 * PAD - K) // STRIDE + 1
    OW = (W + 2 * PAD - K) // STRIDE + 1
    S = OH * OW
    KKC = K * K * C_in

    if compute_dtype is None:
        compute_dtype = x.dtype
    in_bytes = jnp.dtype(compute_dtype).itemsize
    out_bytes = jnp.dtype(x.dtype).itemsize

    TS = _choose_tile_s(S, KKC, C_out, in_bytes, out_bytes, vmem_budget_bytes)
    S_pad = _round_up(S, TS)

    # Zero-pad so every tap coordinate 2*o + k (k < 3) exists; extra rows/cols
    # are zeros beyond the standard pad-1 halo and never affect valid outputs.
    Hp = 2 * OH + 2
    Wp = 2 * OW + 2
    xp = jnp.pad(x, ((0, 0), (0, 0), (PAD, Hp - H - PAD), (PAD, Wp - W - PAD)))

    # im2col: 9 stride-2 tap planes stacked along the contraction axis so the
    # kernel performs ONE (C_out, KKC) @ (KKC, TS) matmul per block.
    planes = [xp[:, :, kh:kh + 2 * OH:STRIDE, kw:kw + 2 * OW:STRIDE]
              for kh in range(K) for kw in range(K)]           # each (N, C_in, OH, OW)
    xcol = jnp.stack(planes, axis=1).reshape(N, KKC, S)        # (N, 9*C_in, OH*OW)
    if S_pad != S:
        xcol = jnp.pad(xcol, ((0, 0), (0, 0), (0, S_pad - S)))
    xcol = xcol.astype(compute_dtype)

    # Fold the 3x3 taps into the contraction dim: (C_out,C_in,K,K) -> (C_out, K*K*C_in)
    # with (kh, kw, c_in) ordering to match the plane stacking above.
    w2 = jnp.transpose(weight, (0, 2, 3, 1)).reshape(C_out, KKC).astype(compute_dtype)
    b2 = bias.reshape(C_out, 1).astype(jnp.float32)

    grid = (N, S_pad // TS)

    def _call(single_buffer_consts):
        const_kwargs = {}
        if single_buffer_consts and hasattr(pl, "Buffered"):
            # Grid-invariant operands: a single VMEM buffer is enough (no re-DMA).
            const_kwargs = dict(pipeline_mode=pl.Buffered(1))
        return pl.pallas_call(
            _downsample_kernel,
            out_shape=jax.ShapeDtypeStruct((N, C_out, S_pad), x.dtype),
            grid_spec=pltpu.PrefetchScalarGridSpec(
                num_scalar_prefetch=0,
                grid=grid,
                in_specs=[
                    pl.BlockSpec((1, KKC, TS), lambda n, s: (n, 0, s)),
                    pl.BlockSpec((C_out, KKC), lambda n, s: (0, 0), **const_kwargs),
                    pl.BlockSpec((C_out, 1), lambda n, s: (0, 0), **const_kwargs),
                ],
                out_specs=pl.BlockSpec((1, C_out, TS), lambda n, s: (n, 0, s)),
            ),
            compiler_params=pltpu.CompilerParams(
                dimension_semantics=("parallel", "parallel"),
                vmem_limit_bytes=32 * 1024 * 1024,
            ),
        )(xcol, w2, b2)

    try:
        out_flat = _call(True)
    except Exception:
        # Fallback if this JAX version rejects pipeline_mode=pl.Buffered(1).
        out_flat = _call(False)

    # Strip lane padding, then a free metadata reshape of contiguous NCHW memory.
    return out_flat[:, :, :S].reshape(N, C_out, OH, OW)


def downsample_reference(x, weight, bias):
    """Pure-JAX reference: Conv2d(dim, dim, 3, stride=2, padding=1)."""
    y = lax.conv_general_dilated(
        x, weight,
        window_strides=(STRIDE, STRIDE),
        padding=((PAD, PAD), (PAD, PAD)),
        dimension_numbers=("NCHW", "OIHW", "NCHW"),
        precision=lax.Precision.HIGHEST,
    )
    return y + bias.reshape(1, -1, 1, 1)


if __name__ == "__main__":
    key = jax.random.PRNGKey(0)
    kx, kw_, kb = jax.random.split(key, 3)

    N, C, H, W = 2, 4, 16, 16
    x = jax.random.normal(kx, (N, C, H, W), dtype=jnp.float32)

    # PyTorch-style init: U(-1/sqrt(fan_in), 1/sqrt(fan_in)), fan_in = C*K*K
    bound = float(1.0 / (C * K * K) ** 0.5)
    weight = jax.random.uniform(kw_, (C, C, K, K), jnp.float32, -bound, bound)
    bias = jax.random.uniform(kb, (C,), jnp.float32, -bound, bound)

    ref = downsample_reference(x, weight, bias)
    OH = (H + 2 * PAD - K) // STRIDE + 1
    OW = (W + 2 * PAD - K) // STRIDE + 1

    # f32 operand path (exact vs. reference).
    out = jax.block_until_ready(downsample_forward(x, weight, bias))
    assert out.shape == (N, C, OH, OW), out.shape
    assert jnp.allclose(out, ref, atol=1e-4, rtol=1e-4), float(
        jnp.max(jnp.abs(out - ref)))

    # bf16 operand path (v6e/v7x MXU feed); f32 accumulate, looser tolerance.
    out_bf16 = jax.block_until_ready(
        downsample_forward(x, weight, bias, compute_dtype=jnp.bfloat16))
    assert out_bf16.shape == (N, C, OH, OW), out_bf16.shape
    assert out_bf16.dtype == jnp.float32
    assert jnp.allclose(out_bf16, ref, atol=5e-2, rtol=5e-2), float(
        jnp.max(jnp.abs(out_bf16 - ref)))

    print("KERNEL_OK")
</pallas_src>

<mosaic_0001>
module attributes {stable_mosaic.version = 11 : i64} {
  func.func @_downsample_kernel(%arg0: i32, %arg1: i32, %arg2: memref<1x36x128xf32, #tpu.memory_space<vmem>>, %arg3: memref<4x36xf32, #tpu.memory_space<vmem>>, %arg4: memref<4x1xf32, #tpu.memory_space<vmem>>, %arg5: memref<1x4x128xf32, #tpu.memory_space<vmem>>) attributes {dimension_semantics = [#tpu.dimension_semantics<parallel>, #tpu.dimension_semantics<parallel>], iteration_bounds = array<i64: 2, 1>, scalar_prefetch = 0 : i64, scratch_operands = 0 : i64, tpu.core_type = #tpu.core_type<tc>, window_params = [{transform_indices = @transform_0, window_bounds = array<i64: 1, 36, 128>}, {pipeline_mode = #tpu.pipeline_mode<synchronous>, transform_indices = @transform_1, window_bounds = array<i64: 4, 36>}, {pipeline_mode = #tpu.pipeline_mode<synchronous>, transform_indices = @transform_2, window_bounds = array<i64: 4, 1>}, {transform_indices = @transform_3, window_bounds = array<i64: 1, 4, 128>}]} {
    %c0 = arith.constant 0 : index
    %c0_0 = arith.constant 0 : index
    %0 = vector.load %arg3[%c0, %c0_0] : memref<4x36xf32, #tpu.memory_space<vmem>>, vector<4x36xf32>
    %c0_1 = arith.constant 0 : index
    %c0_2 = arith.constant 0 : index
    %c0_3 = arith.constant 0 : index
    %1 = vector.load %arg2[%c0_1, %c0_2, %c0_3] : memref<1x36x128xf32, #tpu.memory_space<vmem>>, vector<1x36x128xf32>
    %2 = vector.shape_cast %1 : vector<1x36x128xf32> to vector<36x128xf32>
    %cst = arith.constant dense<0.000000e+00> : vector<4x128xf32>
    %3 = tpu.matmul %0, %2, %cst {dimension_numbers = #tpu.dot_dimension_numbers<[1], [0], [0], [1], [0, 0, 1, 1], [], []>} : vector<4x36xf32>, vector<36x128xf32>, vector<4x128xf32> -> vector<4x128xf32>
    %c0_4 = arith.constant 0 : index
    %c0_5 = arith.constant 0 : index
    %4 = vector.load %arg4[%c0_4, %c0_5] : memref<4x1xf32, #tpu.memory_space<vmem>>, vector<4x1xf32>
    %5 = vector.broadcast %4 : vector<4x1xf32> to vector<4x128xf32>
    %6 = arith.addf %3, %5 : vector<4x128xf32>
    %c0_6 = arith.constant 0 : index
    %c0_7 = arith.constant 0 : index
    %c0_8 = arith.constant 0 : index
    %7 = vector.load %arg5[%c0_6, %c0_7, %c0_8] : memref<1x4x128xf32, #tpu.memory_space<vmem>>, vector<1x4x128xf32>
    %8 = vector.shape_cast %7 : vector<1x4x128xf32> to vector<4x128xf32>
    %9 = vector.shape_cast %6 : vector<4x128xf32> to vector<1x4x128xf32>
    tpu.vector_store %arg5[%c0_6, %c0_7, %c0_8], %9 {strides = array<i32>} : memref<1x4x128xf32, #tpu.memory_space<vmem>>, vector<1x4x128xf32>,
    return
  }
  func.func @transform_0(%arg0: i32, %arg1: i32) -> (i32, i32, i32) {
    %c0_i32 = arith.constant 0 : i32
    %c0_i32_0 = arith.constant 0 : i32
    return %arg0, %c0_i32, %arg1 : i32, i32, i32
  }
  func.func @transform_1(%arg0: i32, %arg1: i32) -> (i32, i32) {
    %c0_i32 = arith.constant 0 : i32
    %c0_i32_0 = arith.constant 0 : i32
    %c0_i32_1 = arith.constant 0 : i32
    return %c0_i32, %c0_i32_0 : i32, i32
  }
  func.func @transform_2(%arg0: i32, %arg1: i32) -> (i32, i32) {
    %c0_i32 = arith.constant 0 : i32
    %c0_i32_0 = arith.constant 0 : i32
    %c0_i32_1 = arith.constant 0 : i32
    return %c0_i32, %c0_i32_0 : i32, i32
  }
  func.func @transform_3(%arg0: i32, %arg1: i32) -> (i32, i32, i32) {
    %c0_i32 = arith.constant 0 : i32
    %c0_i32_0 = arith.constant 0 : i32
    return %arg0, %c0_i32, %arg1 : i32, i32, i32
  }
}

module attributes {stable_mosaic.version = 11 : i64} {
  func.func @_downsample_kernel(%arg0: i32, %arg1: i32, %arg2: memref<1x36x128xf32, #tpu.memory_space<vmem>>, %arg3: memref<4x36xf32, #tpu.memory_space<vmem>>, %arg4: memref<4x1xf32, #tpu.memory_space<vmem>>, %arg5: memref<1x4x128xf32, #tpu.memory_space<vmem>>) attributes {dimension_semantics = [#tpu.dimension_semantics<parallel>, #tpu.dimension_semantics<parallel>], iteration_bounds = array<i64: 2, 1>, scalar_prefetch = 0 : i64, scratch_operands = 0 : i64, tpu.core_type = #tpu.core_type<tc>, window_params = [{transform_indices = @transform_0, window_bounds = array<i64: 1, 36, 128>}, {pipeline_mode = #tpu.pipeline_mode<synchronous>, transform_indices = @transform_1, window_bounds = array<i64: 4, 36>}, {pipeline_mode = #tpu.pipeline_mode<synchronous>, transform_indices = @transform_2, window_bounds = array<i64: 4, 1>}, {transform_indices = @transform_3, window_bounds = array<i64: 1, 4, 128>}]} {
    %c0 = arith.constant 0 : index
    %c0_0 = arith.constant 0 : index
    %0 = vector.load %arg3[%c0, %c0_0] : memref<4x36xf32, #tpu.memory_space<vmem>>, vector<4x36xf32>
    %c0_1 = arith.constant 0 : index
    %c0_2 = arith.constant 0 : index
    %c0_3 = arith.constant 0 : index
    %1 = vector.load %arg2[%c0_1, %c0_2, %c0_3] : memref<1x36x128xf32, #tpu.memory_space<vmem>>, vector<1x36x128xf32>
    %2 = vector.shape_cast %1 : vector<1x36x128xf32> to vector<36x128xf32>
    %cst = arith.constant dense<0.000000e+00> : vector<4x128xf32>
    %3 = tpu.matmul %0, %2, %cst {dimension_numbers = #tpu.dot_dimension_numbers<[1], [0], [0], [1], [0, 0, 1, 1], [], []>} : vector<4x36xf32>, vector<36x128xf32>, vector<4x128xf32> -> vector<4x128xf32>
    %c0_4 = arith.constant 0 : index
    %c0_5 = arith.constant 0 : index
    %4 = vector.load %arg4[%c0_4, %c0_5] : memref<4x1xf32, #tpu.memory_space<vmem>>, vector<4x1xf32>
    %5 = vector.broadcast %4 : vector<4x1xf32> to vector<4x128xf32>
    %6 = arith.addf %3, %5 : vector<4x128xf32>
    %c0_6 = arith.constant 0 : index
    %c0_7 = arith.constant 0 : index
    %c0_8 = arith.constant 0 : index
    %7 = vector.load %arg5[%c0_6, %c0_7, %c0_8] : memref<1x4x128xf32, #tpu.memory_space<vmem>>, vector<1x4x128xf32>
    %8 = vector.shape_cast %7 : vector<1x4x128xf32> to vector<4x128xf32>
    %9 = vector.shape_cast %6 : vector<4x128xf32> to vector<1x4x128xf32>
    tpu.vector_store %arg5[%c0_6, %c0_7, %c0_8], %9 {strides = array<i32>} : memref<1x4x128xf32, #tpu.memory_space<vmem>>, vector<1x4x128xf32>,
    return
  }
  func.func @transform_0(%arg0: i32, %arg1: i32) -> (i32, i32, i32) {
    %c0_i32 = arith.constant 0 : i32
    %c0_i32_0 = arith.constant 0 : i32
    return %arg0, %c0_i32, %arg1 : i32, i32, i32
  }
  func.func @transform_1(%arg0: i32, %arg1: i32) -> (i32, i32) {
    %c0_i32 = arith.constant 0 : i32
    %c0_i32_0 = arith.constant 0 : i32
    %c0_i32_1 = arith.constant 0 : i32
    return %c0_i32, %c0_i32_0 : i32, i32
  }
  func.func @transform_2(%arg0: i32, %arg1: i32) -> (i32, i32) {
    %c0_i32 = arith.constant 0 : i32
    %c0_i32_0 = arith.constant 0 : i32
    %c0_i32_1 = arith.constant 0 : i32
    return %c0_i32, %c0_i32_0 : i32, i32
  }
  func.func @transform_3(%arg0: i32, %arg1: i32) -> (i32, i32, i32) {
    %c0_i32 = arith.constant 0 : i32
    %c0_i32_0 = arith.constant 0 : i32
    return %arg0, %c0_i32, %arg1 : i32, i32, i32
  }
}

</mosaic_0001>

<bundles_post_ra>
// kernel: tpu_custom_call.1
= control target key start
LH: loop header
LB: loop body
LE: loop exit
PB: predicated region body
PF: predicated region fallthrough
CT: control target
= control target key end

     0   :  { %8 = vsyncpa [#allocation3], 0  ;;  %s696_s0 = inlined_call_operand.vmem [shape: f32[2,36,128], index: 0, kind: input, shape index: {}]   ;;  %s697_s1 = inlined_call_operand.vmem [shape: f32[4,36], index: 1, kind: input, shape index: {}]   ;;  %s698_s2 = inlined_call_operand.vmem [shape: f32[4,1], index: 2, kind: input, shape index: {}]   ;;  %s699_s3 = inlined_call_operand.hbm [shape: f32[2,4,128], index: 3, kind: output, shape index: {}]  }
   0x1   :  { %10 = vsyncpa [#allocation3 + $0x1], 0  ;;  %s578_s12 = smov 0   ;;  %s580_s13 = smov 0  }
   0x2   :  { %s582_s14 = smov 0   ;;  %s584_s15 = smov 0  }
   0x3   :  { %s586_s16 = smov 0   ;;  %s588_s17 = smov 0  }
   0x4 LB: > { %s374_s18 = sadd.s32 4294967295, %s551_s17   ;;  %s375_s19 = sadd.s32 4294967294, %s551_s17   ;;  %s551_s17 = sphi %s588_s17, %s16_s17   ;;  %s547_s16 = sphi %s586_s16, %s706_s16   ;;  %s543_s15 = sphi %s584_s15, %s705_s15   ;;  %s539_s14 = sphi %s582_s14, %s704_s14   ;;  %s535_s13 = sphi %s580_s13, %s703_s13   ;;  %s531_s12 = sphi %s578_s12, %s702_s12  }
   0x5   : > { %s28_s20 = sadd.s32 1, %s547_s16  ;;  %s107_s21 = sadd.s32 1, %s539_s14 }
   0x6   : > { %p30_p0 = scmp.ge.s32.totalorder %s28_s20, 2  ;;  %p117_p1 = scmp.ne.s32.totalorder %s539_s14, %s535_s13 }
   0x7   : > { %p118_p2 = scmp.eq.s32.totalorder %s374_s18, 1  ;;  %p123_p3 = scmp.ne.s32.totalorder %s535_s13, %s531_s12 }
   0x8   : > { %s708_s20 = smov (%p30_p0, %s28_s20), 0  ;;  %p124_p5 = scmp.eq.s32.totalorder %s375_s19, 1 }
   0x9   : > { %p618_p4 = por %p118_p2, %p117_p1  ;;  %s102_s23 = ssub.s32 %s547_s16, %s708_s20 }
   0xa   : > { %p378_p6 = scmp.ge.s32.totalorder %s551_s17, 1  ;;  %p105_p7 = scmp.eq.s32.totalorder %s102_s23, 0 }
   0xb   : > { %p625_p8 = por %p124_p5, %p123_p3  ;;  %p159_p9 = scmp.lt.s32.totalorder %s551_s17, 3 }
   0xc   : > { %s631_s25 = scalar_select %p105_p7, %s539_s14, %s107_s21  }
   0xd   : > { %p160_p10 = pnand %p378_p6, %p159_p9 }
   0xe   : > { %p186_p11 = scmp.lt.s32.totalorder (!%p160_p10), %s543_s15, 1  ;;  %v553_v0 = vmov (!%p160_p10), 0.0|0.0   ;;  %vm554_vm0 = vmmov (!%p160_p10), 0   ;;  %v555_v1 = vmov (!%p160_p10), 0.0   ;;  %v200_v2 = vld [vmem:[%s698_s2] sm:$0xf] (!%p160_p10) }
   0xf   : > { %163 = sbr.rel (%p160_p10) target bundleno = 267 (0x10b), region = 32  ;;  %406 = vmatprep.subr.bf16.mxu0 (!%p160_p10), %v553_v0  ;;  %403 = vmatprep.mubr.msk.f32.mxu0 (!%p160_p10), %vm554_vm0, %v555_v1  ;;  %v556_v3 = vmov (!%p160_p10), 0   ;;  %vm210_vm1 = vcmask (!%p160_p10), 1043456   ;;  %v194_v11 = vld [vmem:[%s697_s1] sm:$0xf] (!%p160_p10)  ;;  %vm206_vm2 = vcmask (!%p160_p10), 293888  }
  0x10   : > { %472 = vset.pattern.permute.xlu0 (!%p160_p10), %v556_v3  ;;  %s183_s8 = sand.u32 (!%p160_p10), 1, %s535_s13   ;;  %s384_s10 = sshll.u32 (!%p160_p10), %s543_s15, 6 }
  0x11   : > { %203 = vperm.xlu0 (!%p160_p10), %472, %v200_v2   ;;  %s379_s9 = sshll.u32 (!%p160_p10), %s183_s8, 2  ;;  %s649_s23 = scalar_lea.hbm (!%p160_p10), %s699_s3, %s384_s10 }
  0x12   : > { %s185_s11 = scalar_lea.vmem (!%p160_p10), [#allocation2], %s379_s9  ;;  %s286_s26 = scalar_lea.sflag (!%p160_p10), [#allocation3], %s183_s8 }
  0x13   : > { %s300_s18 = sshll.u32 (!%p160_p10), %s185_s11, 4  ;;  %s651_s18 = int_to_ptr.vmem [resolvable:$true] %s300_s18 }
  0x14   : > { %s473_s27 = scalar_lea.vmem (!%p160_p10), %s651_s18, 64 }
  0x15   : > { %p474_p12 = scmp.ne.s32.totalorder (!%p160_p10), %s651_s18, %s473_s27 }
  0x16   : > { %s187_s28 = scalar_select %p186_p11, %s543_s15, 1 }
  0x17   : > { %p475_p13 = pnand %p474_p12, %p618_p4  ;;  %s557_s15 = smov [#allocation2]  }
  0x18   : > { %s412_s29 = smul.u32 40, %s187_s28  ;;  %s477_s28 = sshll.u32 %s557_s15, 4  ;;  %s478_s28 = int_to_ptr.vmem [resolvable:$false] %s477_s28 }
  0x19   : > { %p476_p0 = pneg %p475_p13  ;;  %p480_p1 = scmp.lt.s32.totalorder %s651_s18, %s478_s28 }
  0x1a   : > { %s193_s5 = scalar_lea.vmem %s696_s0, %s412_s29  ;;  %s479_s29 = scalar_lea.vmem %s478_s28, 128 }
  0x1b   : > { %v195_v4 = vld [vmem:[%s193_s5] sm:$0xff]  ;;  %v196_v5 = vld [vmem:[%s193_s5 + $0x8] sm:$0xff]  ;;  %v197_v6 = vld [vmem:[%s193_s5 + $0x10] sm:$0xff]  ;;  %p481_p2 = scmp.lt.s32.totalorder %s479_s29, %s473_s27 }
  0x1c   : > { %v407_v7 = vpack.c.bf16 %v196_v5, %v195_v4  ;;  %v198_v8 = vld [vmem:[%s193_s5 + $0x18] sm:$0xff]  ;;  %v199_v10 = vld [vmem:[%s193_s5 + $0x20] sm:$0xf] }
  0x1d   : > { %v410_v9 = vpack.c.bf16 %v198_v8, %v197_v6  ;;  %p482_p3 = por %p481_p2, %p480_p1 }
  0x1e   : > { %408 = vmatpush3.bf16.msra.mxu0 %v407_v7 }
  0x1f   : > { %409 = vmatprep.subr.bf16.mxu0 %v553_v0  ;;  %p483_p5 = pnand %p482_p3, %p476_p0 }
  0x22   : > { %411 = vmatpush3.bf16.msra.mxu0 %v410_v9 }
  0x23   : > { %401 = vmatprep.subr.mxu0 %v555_v1 }
  0x26   : > { %402 = vmatpush3.msk.msra.mxu0 %vm210_vm1, %v199_v10 }
  0x27   : > { %404 = vmatmul.mubr.msk.f32.vlgmr.msra.gmra.mrb[0].mxu0 %vm206_vm2, %v194_v11 }
  0x90   : > { %v204_v12 = vpop.permute.xlu0 %203 }
  0xfa   : > { %v280_v13 = vpop.f32.mrb[0].mxu0 }
  0xfb   : > { %v281_v14 = vadd.f32 %v280_v13, %v204_v12  ;;  %v405_v15 = vpop.f32.mrb[1].mxu0 }
  0xfd   : > { %284 = vst [vmem:[%s185_s11] sm:$0xf] %v281_v14 }
  0xfe   : > { %486 = shalt.err (!%p483_p5)
}
  0xff   : > { %s487_s30 = scalar_lea.hbm %s649_s23, 64  ;;  %s491_s6 = scalar_lea.hbm %s699_s3, 128 }
 0x100   : > { %p488_p6 = scmp.ne.s32.totalorder %s649_s23, %s487_s30  ;;  %p492_p10 = scmp.lt.u32.totalorder %s649_s23, %s699_s3 }
 0x101   : > { %p493_p11 = scmp.lt.u32.totalorder %s491_s6, %s487_s30  ;;  %p495_p13 = scmp.lt.u32.totalorder %s487_s30, %s649_s23 }
 0x102   : > { %p489_p7 = pnand %p488_p6, %p618_p4 }
 0x103   : > { %p494_p12 = por %p493_p11, %p492_p10 }
 0x104   : > { %p490_p9 = pneg %p489_p7 }
 0x105   : > { %p496_p0 = por %p495_p13, %p494_p12 }
 0x107   : > { %p497_p1 = pnand %p496_p0, %p490_p9 }
 0x109   : > { %500 = shalt.err (!%p497_p1)
}
 0x10a   : > { %413 = dma.vmem_to_hbm [thread:$0]  (%p618_p4), %s651_s18, 64, %s649_s23, %s286_s26  }
 0x10b PF: > { %p419_p2 = scmp.ge.s32.totalorder %s551_s17, 2  ;;  %s312_s9 = sand.u32 1, %s531_s12  }
 0x10c   : > { %s313_s10 = scalar_lea.sflag [#allocation3], %s312_s9 }
 0x10d   : > { %p416_p3 = pnand %p419_p2, %p625_p8 }
 0x10f   : > { %526 = dma.done.wait (!%p416_p3), %s313_s10, 64  }
 0x110   : > { %528 = vsyncadd (!%p416_p3), %s313_s10, 4294967232  ;;  %s16_s17 = sadd.s32 1, %s551_s17   ;;  %s702_s12 = smov %s535_s13 }
 0x111   : > { %p13_p5 = scmp.ge.s32.totalorder %s16_s17, 4   ;;  %s703_s13 = smov %s539_s14 }
 0x112   : > { %s704_s14 = smov %s631_s25  ;;  %s705_s15 = smov %s547_s16 }
 0x113   : > { %s706_s16 = smov %s708_s20  ;;  %15 = sbr.rel (!%p13_p5) target bundleno = 4 (0x4), region = 67 }
 0x11a   :  { %318 = vsyncpa [#allocation3], 1 }
 0x11b   :  { %320 = vsyncpa [#allocation3 + $0x1], 1 }

// kernel: tpu_custom_call.1
= control target key start
LH: loop header
LB: loop body
LE: loop exit
PB: predicated region body
PF: predicated region fallthrough
CT: control target
= control target key end

     0   :  { %8 = vsyncpa [#allocation3], 0  ;;  %s696_s0 = inlined_call_operand.vmem [shape: f32[2,36,128], index: 0, kind: input, shape index: {}]   ;;  %s697_s1 = inlined_call_operand.vmem [shape: f32[4,36], index: 1, kind: input, shape index: {}]   ;;  %s698_s2 = inlined_call_operand.vmem [shape: f32[4,1], index: 2, kind: input, shape index: {}]   ;;  %s699_s3 = inlined_call_operand.hbm [shape: f32[2,4,128], index: 3, kind: output, shape index: {}]  }
   0x1   :  { %10 = vsyncpa [#allocation3 + $0x1], 0  ;;  %s578_s12 = smov 0   ;;  %s580_s13 = smov 0  }
   0x2   :  { %s582_s14 = smov 0   ;;  %s584_s15 = smov 0  }
   0x3   :  { %s586_s16 = smov 0   ;;  %s588_s17 = smov 0  }
   0x4 LB: > { %s374_s18 = sadd.s32 4294967295, %s551_s17   ;;  %s375_s19 = sadd.s32 4294967294, %s551_s17   ;;  %s551_s17 = sphi %s588_s17, %s16_s17   ;;  %s547_s16 = sphi %s586_s16, %s706_s16   ;;  %s543_s15 = sphi %s584_s15, %s705_s15   ;;  %s539_s14 = sphi %s582_s14, %s704_s14   ;;  %s535_s13 = sphi %s580_s13, %s703_s13   ;;  %s531_s12 = sphi %s578_s12, %s702_s12  }
   0x5   : > { %s28_s20 = sadd.s32 1, %s547_s16  ;;  %s107_s21 = sadd.s32 1, %s539_s14 }
   0x6   : > { %p30_p0 = scmp.ge.s32.totalorder %s28_s20, 2  ;;  %p117_p1 = scmp.ne.s32.totalorder %s539_s14, %s535_s13 }
   0x7   : > { %p118_p2 = scmp.eq.s32.totalorder %s374_s18, 1  ;;  %p123_p3 = scmp.ne.s32.totalorder %s535_s13, %s531_s12 }
   0x8   : > { %s708_s20 = smov (%p30_p0, %s28_s20), 0  ;;  %p124_p5 = scmp.eq.s32.totalorder %s375_s19, 1 }
   0x9   : > { %p618_p4 = por %p118_p2, %p117_p1  ;;  %s102_s23 = ssub.s32 %s547_s16, %s708_s20 }
   0xa   : > { %p378_p6 = scmp.ge.s32.totalorder %s551_s17, 1  ;;  %p105_p7 = scmp.eq.s32.totalorder %s102_s23, 0 }
   0xb   : > { %p625_p8 = por %p124_p5, %p123_p3  ;;  %p159_p9 = scmp.lt.s32.totalorder %s551_s17, 3 }
   0xc   : > { %s631_s25 = scalar_select %p105_p7, %s539_s14, %s107_s21  }
   0xd   : > { %p160_p10 = pnand %p378_p6, %p159_p9 }
   0xe   : > { %p186_p11 = scmp.lt.s32.totalorder (!%p160_p10), %s543_s15, 1  ;;  %v553_v0 = vmov (!%p160_p10), 0.0|0.0   ;;  %vm554_vm0 = vmmov (!%p160_p10), 0   ;;  %v555_v1 = vmov (!%p160_p10), 0.0   ;;  %v200_v2 = vld [vmem:[%s698_s2] sm:$0xf] (!%p160_p10) }
   0xf   : > { %163 = sbr.rel (%p160_p10) target bundleno = 267 (0x10b), region = 32  ;;  %406 = vmatprep.subr.bf16.mxu0 (!%p160_p10), %v553_v0  ;;  %403 = vmatprep.mubr.msk.f32.mxu0 (!%p160_p10), %vm554_vm0, %v555_v1  ;;  %v556_v3 = vmov (!%p160_p10), 0   ;;  %vm210_vm1 = vcmask (!%p160_p10), 1043456   ;;  %v194_v11 = vld [vmem:[%s697_s1] sm:$0xf] (!%p160_p10)  ;;  %vm206_vm2 = vcmask (!%p160_p10), 293888  }
  0x10   : > { %472 = vset.pattern.permute.xlu0 (!%p160_p10), %v556_v3  ;;  %s183_s8 = sand.u32 (!%p160_p10), 1, %s535_s13   ;;  %s384_s10 = sshll.u32 (!%p160_p10), %s543_s15, 6 }
  0x11   : > { %203 = vperm.xlu0 (!%p160_p10), %472, %v200_v2   ;;  %s379_s9 = sshll.u32 (!%p160_p10), %s183_s8, 2  ;;  %s649_s23 = scalar_lea.hbm (!%p160_p10), %s699_s3, %s384_s10 }
  0x12   : > { %s185_s11 = scalar_lea.vmem (!%p160_p10), [#allocation2], %s379_s9  ;;  %s286_s26 = scalar_lea.sflag (!%p160_p10), [#allocation3], %s183_s8 }
  0x13   : > { %s300_s18 = sshll.u32 (!%p160_p10), %s185_s11, 4  ;;  %s651_s18 = int_to_ptr.vmem [resolvable:$true] %s300_s18 }
  0x14   : > { %s473_s27 = scalar_lea.vmem (!%p160_p10), %s651_s18, 64 }
  0x15   : > { %p474_p12 = scmp.ne.s32.totalorder (!%p160_p10), %s651_s18, %s473_s27 }
  0x16   : > { %s187_s28 = scalar_select %p186_p11, %s543_s15, 1 }
  0x17   : > { %p475_p13 = pnand %p474_p12, %p618_p4  ;;  %s557_s15 = smov [#allocation2]  }
  0x18   : > { %s412_s29 = smul.u32 40, %s187_s28  ;;  %s477_s28 = sshll.u32 %s557_s15, 4  ;;  %s478_s28 = int_to_ptr.vmem [resolvable:$false] %s477_s28 }
  0x19   : > { %p476_p0 = pneg %p475_p13  ;;  %p480_p1 = scmp.lt.s32.totalorder %s651_s18, %s478_s28 }
  0x1a   : > { %s193_s5 = scalar_lea.vmem %s696_s0, %s412_s29  ;;  %s479_s29 = scalar_lea.vmem %s478_s28, 128 }
  0x1b   : > { %v195_v4 = vld [vmem:[%s193_s5] sm:$0xff]  ;;  %v196_v5 = vld [vmem:[%s193_s5 + $0x8] sm:$0xff]  ;;  %v197_v6 = vld [vmem:[%s193_s5 + $0x10] sm:$0xff]  ;;  %p481_p2 = scmp.lt.s32.totalorder %s479_s29, %s473_s27 }
  0x1c   : > { %v407_v7 = vpack.c.bf16 %v196_v5, %v195_v4  ;;  %v198_v8 = vld [vmem:[%s193_s5 + $0x18] sm:$0xff]  ;;  %v199_v10 = vld [vmem:[%s193_s5 + $0x20] sm:$0xf] }
  0x1d   : > { %v410_v9 = vpack.c.bf16 %v198_v8, %v197_v6  ;;  %p482_p3 = por %p481_p2, %p480_p1 }
  0x1e   : > { %408 = vmatpush3.bf16.msra.mxu0 %v407_v7 }
  0x1f   : > { %409 = vmatprep.subr.bf16.mxu0 %v553_v0  ;;  %p483_p5 = pnand %p482_p3, %p476_p0 }
  0x22   : > { %411 = vmatpush3.bf16.msra.mxu0 %v410_v9 }
  0x23   : > { %401 = vmatprep.subr.mxu0 %v555_v1 }
  0x26   : > { %402 = vmatpush3.msk.msra.mxu0 %vm210_vm1, %v199_v10 }
  0x27   : > { %404 = vmatmul.mubr.msk.f32.vlgmr.msra.gmra.mrb[0].mxu0 %vm206_vm2, %v194_v11 }
  0x90   : > { %v204_v12 = vpop.permute.xlu0 %203 }
  0xfa   : > { %v280_v13 = vpop.f32.mrb[0].mxu0 }
  0xfb   : > { %v281_v14 = vadd.f32 %v280_v13, %v204_v12  ;;  %v405_v15 = vpop.f32.mrb[1].mxu0 }
  0xfd   : > { %284 = vst [vmem:[%s185_s11] sm:$0xf] %v281_v14 }
  0xfe   : > { %486 = shalt.err (!%p483_p5)
}
  0xff   : > { %s487_s30 = scalar_lea.hbm %s649_s23, 64  ;;  %s491_s6 = scalar_lea.hbm %s699_s3, 128 }
 0x100   : > { %p488_p6 = scmp.ne.s32.totalorder %s649_s23, %s487_s30  ;;  %p492_p10 = scmp.lt.u32.totalorder %s649_s23, %s699_s3 }
 0x101   : > { %p493_p11 = scmp.lt.u32.totalorder %s491_s6, %s487_s30  ;;  %p495_p13 = scmp.lt.u32.totalorder %s487_s30, %s649_s23 }
 0x102   : > { %p489_p7 = pnand %p488_p6, %p618_p4 }
 0x103   : > { %p494_p12 = por %p493_p11, %p492_p10 }
 0x104   : > { %p490_p9 = pneg %p489_p7 }
 0x105   : > { %p496_p0 = por %p495_p13, %p494_p12 }
 0x107   : > { %p497_p1 = pnand %p496_p0, %p490_p9 }
 0x109   : > { %500 = shalt.err (!%p497_p1)
}
 0x10a   : > { %413 = dma.vmem_to_hbm [thread:$0]  (%p618_p4), %s651_s18, 64, %s649_s23, %s286_s26  }
 0x10b PF: > { %p419_p2 = scmp.ge.s32.totalorder %s551_s17, 2  ;;  %s312_s9 = sand.u32 1, %s531_s12  }
 0x10c   : > { %s313_s10 = scalar_lea.sflag [#allocation3], %s312_s9 }
 0x10d   : > { %p416_p3 = pnand %p419_p2, %p625_p8 }
 0x10f   : > { %526 = dma.done.wait (!%p416_p3), %s313_s10, 64  }
 0x110   : > { %528 = vsyncadd (!%p416_p3), %s313_s10, 4294967232  ;;  %s16_s17 = sadd.s32 1, %s551_s17   ;;  %s702_s12 = smov %s535_s13 }
 0x111   : > { %p13_p5 = scmp.ge.s32.totalorder %s16_s17, 4   ;;  %s703_s13 = smov %s539_s14 }
 0x112   : > { %s704_s14 = smov %s631_s25  ;;  %s705_s15 = smov %s547_s16 }
 0x113   : > { %s706_s16 = smov %s708_s20  ;;  %15 = sbr.rel (!%p13_p5) target bundleno = 4 (0x4), region = 67 }
 0x11a   :  { %318 = vsyncpa [#allocation3], 1 }
 0x11b   :  { %320 = vsyncpa [#allocation3 + $0x1], 1 }

</bundles_post_ra>
